<compile_context>
chip_gen: v6e
topology: v6e:2x2x1
jax: 0.10.0
libtpu: 0.0.40
codegen_flags: <defaults>
</compile_context>

<pallas_src>
import math
from functools import partial

import jax
import jax.numpy as jnp
import numpy as np
from jax.experimental import pallas as pl
from jax.experimental.pallas import tpu as pltpu

# ------------------------- small config (consistent with the module) -------------------------
D_MODEL = 64          # d_model
N_HEAD = 4            # n_head
HEAD_DIM = D_MODEL // N_HEAD
D_FF = 4 * D_MODEL    # mlp hidden (c_fc)
SEQ = 8               # L
BATCH = 2             # bs
LN_EPS = 1e-5         # torch.nn.LayerNorm default


def _ln_no_affine(v):
    # LayerNorm core (float32); affine gain/bias are folded into the following linear weights.
    mu = jnp.mean(v, axis=-1, keepdims=True)
    var = jnp.mean((v - mu) ** 2, axis=-1, keepdims=True)
    return (v - mu) * jax.lax.rsqrt(var + LN_EPS)


# ------------------------------------ Pallas kernel ------------------------------------
def residual_block_kernel(x_ref, bias_ref, bfc_ref, wq_ref, wk_ref, wv_ref,
                          wo_ref, wfc_ref, wproj_ref, o_ref, *, n_head, head_dim):
    # One batch element per grid step: x_ref block is (1, L, C); residual stream kept in f32.
    x = x_ref[0]                                      # (L, C) float32

    bq = bias_ref[0:1, :]
    bk = bias_ref[1:2, :]
    bv = bias_ref[2:3, :]
    bo = bias_ref[3:4, :]
    bproj = bias_ref[4:5, :]

    # ---------------- x = x + attention(ln_1(x)) ----------------
    # (ln_1 affine and the 1/sqrt(head_dim) scale were folded into wq/wk/wv/bq/bk/bv at init)
    xn = _ln_no_affine(x).astype(jnp.bfloat16)        # bf16 MXU operand, f32 accumulate
    q = jnp.dot(xn, wq_ref[...], preferred_element_type=jnp.float32) + bq
    k = jnp.dot(xn, wk_ref[...], preferred_element_type=jnp.float32) + bk
    v = jnp.dot(xn, wv_ref[...], preferred_element_type=jnp.float32) + bv

    # Per-head attention: static unroll, contraction over head_dim only (no lane masks).
    heads = []
    for h in range(n_head):
        sl = slice(h * head_dim, (h + 1) * head_dim)
        qh = q[:, sl].astype(jnp.bfloat16)            # (L, hd)
        kh = k[:, sl].astype(jnp.bfloat16)
        vh = v[:, sl].astype(jnp.bfloat16)
        # s[i, j] = sum_d qh[i, d] * kh[j, d]
        s = jax.lax.dot_general(qh, kh, (((1,), (1,)), ((), ())),
                                preferred_element_type=jnp.float32)   # (L, L) f32
        s = s - jnp.max(s, axis=-1, keepdims=True)
        p = jnp.exp(s)
        p = p / jnp.sum(p, axis=-1, keepdims=True)    # exact divide (f32 softmax)
        heads.append(jnp.dot(p.astype(jnp.bfloat16), vh,
                             preferred_element_type=jnp.float32))     # (L, hd)
    attn = jnp.concatenate(heads, axis=-1)            # (L, C) f32

    x = x + jnp.dot(attn.astype(jnp.bfloat16), wo_ref[...],
                    preferred_element_type=jnp.float32) + bo

    # ---------------- x = x + mlp(ln_2(x))  (c_fc -> QuickGELU -> c_proj) ----------------
    xn2 = _ln_no_affine(x).astype(jnp.bfloat16)       # ln_2 affine folded into wfc/bfc
    hdn = jnp.dot(xn2, wfc_ref[...], preferred_element_type=jnp.float32) + bfc_ref[...]
    hdn = hdn * jax.nn.sigmoid(1.702 * hdn)           # QuickGELU, f32 elementwise (v5e-safe)
    o_ref[0] = x + jnp.dot(hdn.astype(jnp.bfloat16), wproj_ref[...],
                           preferred_element_type=jnp.float32) + bproj


def run_block(x_lbc, kparams):
    """x_lbc: (L, bs, C) float32 (native module layout). kparams: see prepare_kernel_params."""
    L, bs, C = x_lbc.shape
    bias_pack, bfc, wq, wk, wv, wo, wfc, wproj = kparams
    FF = wfc.shape[1]

    # (L, bs, C) -> (bs, L, C): per-batch grid step; cross-batch attention is impossible by
    # construction (no block-diagonal mask, no (L*bs)^2 score slab).
    xb = jnp.transpose(x_lbc, (1, 0, 2))

    # Advisory cost estimate (q/k/v/out-proj + scores/PV + MLP), per batch element * bs.
    flops = bs * (4 * 2 * L * C * C + 2 * (2 * L * L * C) + 2 * (2 * L * C * FF))
    transcendentals = bs * (N_HEAD * L * L + L * FF + 2 * L)
    bytes_accessed = (2 * bs * L * C * 4
                      + 2 * (wq.size + wk.size + wv.size + wo.size + wfc.size + wproj.size)
                      + 4 * (bias_pack.size + bfc.size))

    kernel = partial(residual_block_kernel, n_head=N_HEAD, head_dim=HEAD_DIM)
    const2 = lambda b: (0, 0)                         # weights/biases: resident across the grid
    out = pl.pallas_call(
        kernel,
        out_shape=jax.ShapeDtypeStruct((bs, L, C), jnp.float32),
        grid=(bs,),
        in_specs=[
            pl.BlockSpec((1, L, C), lambda b: (b, 0, 0)),   # activations: pipelined per batch
            pl.BlockSpec(bias_pack.shape, const2),
            pl.BlockSpec(bfc.shape, const2),
            pl.BlockSpec(wq.shape, const2),
            pl.BlockSpec(wk.shape, const2),
            pl.BlockSpec(wv.shape, const2),
            pl.BlockSpec(wo.shape, const2),
            pl.BlockSpec(wfc.shape, const2),
            pl.BlockSpec(wproj.shape, const2),
        ],
        out_specs=pl.BlockSpec((1, L, C), lambda b: (b, 0, 0)),
        compiler_params=pltpu.CompilerParams(
            dimension_semantics=("parallel",),        # v7x: split batch across the 2 TCs
            vmem_limit_bytes=32 * 1024 * 1024,
        ),
        cost_estimate=pl.CostEstimate(flops=flops, transcendentals=transcendentals,
                                      bytes_accessed=bytes_accessed),
    )(xb, bias_pack, bfc, wq, wk, wv, wo, wfc, wproj)
    return jnp.transpose(out, (1, 0, 2))              # back to native (L, bs, C)


# ------------------------------ parameter init (deterministic) ------------------------------
def init_raw_params(key):
    """Parameters in torch-equivalent form; weights stored transposed for `x @ W`."""
    ks = jax.random.split(key, 16)
    s = 0.05
    g1 = 1.0 + 0.1 * jax.random.normal(ks[0], (1, D_MODEL), jnp.float32)   # ln_1.weight
    b1 = 0.05 * jax.random.normal(ks[1], (1, D_MODEL), jnp.float32)        # ln_1.bias
    wq = s * jax.random.normal(ks[2], (D_MODEL, D_MODEL), jnp.float32)     # in_proj (q) .T
    bq = s * jax.random.normal(ks[3], (1, D_MODEL), jnp.float32)
    wk = s * jax.random.normal(ks[4], (D_MODEL, D_MODEL), jnp.float32)     # in_proj (k) .T
    bk = s * jax.random.normal(ks[5], (1, D_MODEL), jnp.float32)
    wv = s * jax.random.normal(ks[6], (D_MODEL, D_MODEL), jnp.float32)     # in_proj (v) .T
    bv = s * jax.random.normal(ks[7], (1, D_MODEL), jnp.float32)
    wo = s * jax.random.normal(ks[8], (D_MODEL, D_MODEL), jnp.float32)     # out_proj.weight.T
    bo = s * jax.random.normal(ks[9], (1, D_MODEL), jnp.float32)
    g2 = 1.0 + 0.1 * jax.random.normal(ks[10], (1, D_MODEL), jnp.float32)  # ln_2.weight
    b2 = 0.05 * jax.random.normal(ks[11], (1, D_MODEL), jnp.float32)       # ln_2.bias
    wfc = s * jax.random.normal(ks[12], (D_MODEL, D_FF), jnp.float32)      # c_fc.weight.T
    bfc = s * jax.random.normal(ks[13], (1, D_FF), jnp.float32)
    wproj = s * jax.random.normal(ks[14], (D_FF, D_MODEL), jnp.float32)    # c_proj.weight.T
    bproj = s * jax.random.normal(ks[15], (1, D_MODEL), jnp.float32)
    return (g1, b1, wq, bq, wk, bk, wv, bv, wo, bo, g2, b2, wfc, bfc, wproj, bproj)


def prepare_kernel_params(raw):
    """Host-side folding: LN affine -> adjacent linears, 1/sqrt(hd) -> Q, bias packing.
    Folding is done in f32; weights are then cast to bf16 (MXU-native on v6e/v7x)."""
    (g1, b1, wq, bq, wk, bk, wv, bv, wo, bo, g2, b2, wfc, bfc, wproj, bproj) = raw
    scale = 1.0 / math.sqrt(HEAD_DIM)
    g1c = g1.reshape(-1, 1)
    wq_f = (g1c * wq) * scale
    bq_f = (b1 @ wq + bq) * scale
    wk_f = g1c * wk
    bk_f = b1 @ wk + bk
    wv_f = g1c * wv
    bv_f = b1 @ wv + bv
    g2c = g2.reshape(-1, 1)
    wfc_f = g2c * wfc
    bfc_f = b2 @ wfc + bfc
    # Pack the five width-C bias vectors into one (8, C) f32 array (rows 5-7 unused padding).
    bias_pack = jnp.zeros((8, D_MODEL), jnp.float32)
    for i, vec in enumerate((bq_f, bk_f, bv_f, bo, bproj)):
        bias_pack = bias_pack.at[i].set(vec[0])
    bf16 = lambda w: w.astype(jnp.bfloat16)
    return (bias_pack, bfc_f.astype(jnp.float32),
            bf16(wq_f), bf16(wk_f), bf16(wv_f), bf16(wo), bf16(wfc_f), bf16(wproj))


# ------------------------------ pure-JAX reference (for checking) ------------------------------
def reference_block(x_lbc, raw):
    (g1, b1, wq, bq, wk, bk, wv, bv, wo, bo, g2, b2, wfc, bfc, wproj, bproj) = raw
    L, bs, C = x_lbc.shape

    def ln(v, g, b):
        mu = jnp.mean(v, axis=-1, keepdims=True)
        var = jnp.mean((v - mu) ** 2, axis=-1, keepdims=True)
        return (v - mu) * jax.lax.rsqrt(var + LN_EPS) * g + b

    xn = ln(x_lbc, g1, b1)
    q = xn @ wq + bq
    k = xn @ wk + bk
    v = xn @ wv + bv

    def split(t):   # (L, bs, C) -> (bs, nh, L, hd)
        return t.reshape(L, bs, N_HEAD, HEAD_DIM).transpose(1, 2, 0, 3)

    qh, kh, vh = split(q), split(k), split(v)
    s = (qh @ kh.transpose(0, 1, 3, 2)) / math.sqrt(HEAD_DIM)
    p = jax.nn.softmax(s, axis=-1)
    o = (p @ vh).transpose(2, 0, 1, 3).reshape(L, bs, C)
    x = x_lbc + o @ wo + bo
    xn2 = ln(x, g2, b2)
    h = xn2 @ wfc + bfc
    h = h * jax.nn.sigmoid(1.702 * h)
    return x + h @ wproj + bproj


# ------------------------------ MAPLE forward wrapper ------------------------------
def maple_block_forward(inputs, kparams):
    """inputs = ([x, compound_prompts_deeper, counter], prior, text_context), x: (L, bs, C).
    first_layer=True, adapter=False, text_layer=False -> prompt surgery & adapter are no-ops."""
    x_list, prior, text_context = inputs
    x, compound_prompts_deeper, counter = x_list[0], x_list[1], x_list[2]
    y = run_block(x, kparams)
    return ([y, compound_prompts_deeper, counter], prior, text_context)


if __name__ == "__main__":
    key = jax.random.PRNGKey(0)
    kx, kp = jax.random.split(key)
    # x: L * bs * C, as documented in the module's forward docstring.
    x = jax.random.normal(kx, (SEQ, BATCH, D_MODEL), jnp.float32)
    raw = init_raw_params(kp)
    kparams = prepare_kernel_params(raw)

    inputs = ([x, [], 0], None, None)                  # (x_list, prior, text_context)
    out_list, prior, text_context = maple_block_forward(inputs, kparams)
    y = jax.block_until_ready(out_list[0])

    # Correctness check against a pure-JAX f32 reference of the original (unfolded) math.
    # Tolerance accounts for bf16 MXU operands (weights/activations) + host-side folding.
    y_ref = reference_block(x, raw)
    np.testing.assert_allclose(np.asarray(y), np.asarray(y_ref), rtol=5e-3, atol=5e-3)

    print("KERNEL_OK")
</pallas_src>

<mosaic_0001>
module attributes {stable_mosaic.version = 11 : i64} {
  func.func @residual_block_kernel(%arg0: i32, %arg1: memref<1x8x64xf32, #tpu.memory_space<vmem>>, %arg2: memref<8x64xf32, #tpu.memory_space<vmem>>, %arg3: memref<1x256xf32, #tpu.memory_space<vmem>>, %arg4: memref<64x64xbf16, #tpu.memory_space<vmem>>, %arg5: memref<64x64xbf16, #tpu.memory_space<vmem>>, %arg6: memref<64x64xbf16, #tpu.memory_space<vmem>>, %arg7: memref<64x64xbf16, #tpu.memory_space<vmem>>, %arg8: memref<64x256xbf16, #tpu.memory_space<vmem>>, %arg9: memref<256x64xbf16, #tpu.memory_space<vmem>>, %arg10: memref<1x8x64xf32, #tpu.memory_space<vmem>>) attributes {dimension_semantics = [#tpu.dimension_semantics<parallel>], iteration_bounds = array<i64: 2>, scalar_prefetch = 0 : i64, scratch_operands = 0 : i64, tpu.core_type = #tpu.core_type<tc>, window_params = [{transform_indices = @transform_0, window_bounds = array<i64: 1, 8, 64>}, {pipeline_mode = #tpu.pipeline_mode<synchronous>, transform_indices = @transform_1, window_bounds = array<i64: 8, 64>}, {pipeline_mode = #tpu.pipeline_mode<synchronous>, transform_indices = @transform_2, window_bounds = array<i64: 1, 256>}, {pipeline_mode = #tpu.pipeline_mode<synchronous>, transform_indices = @transform_3, window_bounds = array<i64: 64, 64>}, {pipeline_mode = #tpu.pipeline_mode<synchronous>, transform_indices = @transform_4, window_bounds = array<i64: 64, 64>}, {pipeline_mode = #tpu.pipeline_mode<synchronous>, transform_indices = @transform_5, window_bounds = array<i64: 64, 64>}, {pipeline_mode = #tpu.pipeline_mode<synchronous>, transform_indices = @transform_6, window_bounds = array<i64: 64, 64>}, {pipeline_mode = #tpu.pipeline_mode<synchronous>, transform_indices = @transform_7, window_bounds = array<i64: 64, 256>}, {pipeline_mode = #tpu.pipeline_mode<synchronous>, transform_indices = @transform_8, window_bounds = array<i64: 256, 64>}, {transform_indices = @transform_9, window_bounds = array<i64: 1, 8, 64>}]} {
    %c0 = arith.constant 0 : index
    %c0_0 = arith.constant 0 : index
    %c0_1 = arith.constant 0 : index
    %0 = vector.load %arg1[%c0, %c0_0, %c0_1] : memref<1x8x64xf32, #tpu.memory_space<vmem>>, vector<1x8x64xf32>
    %1 = vector.shape_cast %0 : vector<1x8x64xf32> to vector<8x64xf32>
    %c0_2 = arith.constant 0 : index
    %c0_3 = arith.constant 0 : index
    %2 = vector.load %arg2[%c0_2, %c0_3] : memref<8x64xf32, #tpu.memory_space<vmem>>, vector<1x64xf32>
    %c1 = arith.constant 1 : index
    %c0_4 = arith.constant 0 : index
    %3 = vector.load %arg2[%c1, %c0_4] : memref<8x64xf32, #tpu.memory_space<vmem>>, vector<1x64xf32>
    %c2 = arith.constant 2 : index
    %c0_5 = arith.constant 0 : index
    %4 = vector.load %arg2[%c2, %c0_5] : memref<8x64xf32, #tpu.memory_space<vmem>>, vector<1x64xf32>
    %c3 = arith.constant 3 : index
    %c0_6 = arith.constant 0 : index
    %5 = vector.load %arg2[%c3, %c0_6] : memref<8x64xf32, #tpu.memory_space<vmem>>, vector<1x64xf32>
    %c4 = arith.constant 4 : index
    %c0_7 = arith.constant 0 : index
    %6 = vector.load %arg2[%c4, %c0_7] : memref<8x64xf32, #tpu.memory_space<vmem>>, vector<1x64xf32>
    %cst = arith.constant dense<0.000000e+00> : vector<8xf32>
    %7 = vector.multi_reduction <add>, %1, %cst [1] : vector<8x64xf32> to vector<8xf32>
    %8 = vector.shape_cast %7 : vector<8xf32> to vector<8x1xf32>
    %cst_8 = arith.constant 6.400000e+01 : f32
    %9 = vector.broadcast %cst_8 : f32 to vector<8x1xf32>
    %10 = arith.divf %8, %9 : vector<8x1xf32>
    %11 = vector.broadcast %10 : vector<8x1xf32> to vector<8x64xf32>
    %12 = arith.subf %1, %11 : vector<8x64xf32>
    %13 = arith.mulf %12, %12 : vector<8x64xf32>
    %cst_9 = arith.constant dense<0.000000e+00> : vector<8xf32>
    %14 = vector.multi_reduction <add>, %13, %cst_9 [1] : vector<8x64xf32> to vector<8xf32>
    %15 = vector.shape_cast %14 : vector<8xf32> to vector<8x1xf32>
    %cst_10 = arith.constant 6.400000e+01 : f32
    %16 = vector.broadcast %cst_10 : f32 to vector<8x1xf32>
    %17 = arith.divf %15, %16 : vector<8x1xf32>
    %18 = vector.broadcast %10 : vector<8x1xf32> to vector<8x64xf32>
    %19 = arith.subf %1, %18 : vector<8x64xf32>
    %cst_11 = arith.constant 9.99999974E-6 : f32
    %20 = vector.broadcast %cst_11 : f32 to vector<8x1xf32>
    %21 = arith.addf %17, %20 : vector<8x1xf32>
    %22 = math.rsqrt %21 : vector<8x1xf32>
    %23 = vector.broadcast %22 : vector<8x1xf32> to vector<8x64xf32>
    %24 = arith.mulf %19, %23 : vector<8x64xf32>
    %25 = arith.truncf %24 : vector<8x64xf32> to vector<8x64xbf16>
    %c0_12 = arith.constant 0 : index
    %c0_13 = arith.constant 0 : index
    %26 = vector.load %arg4[%c0_12, %c0_13] : memref<64x64xbf16, #tpu.memory_space<vmem>>, vector<64x64xbf16>
    %cst_14 = arith.constant dense<0.000000e+00> : vector<8x64xf32>
    %27 = tpu.matmul %25, %26, %cst_14 {dimension_numbers = #tpu.dot_dimension_numbers<[1], [0], [0], [1], [0, 0, 1, 1], [], []>} : vector<8x64xbf16>, vector<64x64xbf16>, vector<8x64xf32> -> vector<8x64xf32>
    %28 = vector.broadcast %2 : vector<1x64xf32> to vector<8x64xf32>
    %29 = arith.addf %27, %28 : vector<8x64xf32>
    %c0_15 = arith.constant 0 : index
    %c0_16 = arith.constant 0 : index
    %30 = vector.load %arg5[%c0_15, %c0_16] : memref<64x64xbf16, #tpu.memory_space<vmem>>, vector<64x64xbf16>
    %cst_17 = arith.constant dense<0.000000e+00> : vector<8x64xf32>
    %31 = tpu.matmul %25, %30, %cst_17 {dimension_numbers = #tpu.dot_dimension_numbers<[1], [0], [0], [1], [0, 0, 1, 1], [], []>} : vector<8x64xbf16>, vector<64x64xbf16>, vector<8x64xf32> -> vector<8x64xf32>
    %32 = vector.broadcast %3 : vector<1x64xf32> to vector<8x64xf32>
    %33 = arith.addf %31, %32 : vector<8x64xf32>
    %c0_18 = arith.constant 0 : index
    %c0_19 = arith.constant 0 : index
    %34 = vector.load %arg6[%c0_18, %c0_19] : memref<64x64xbf16, #tpu.memory_space<vmem>>, vector<64x64xbf16>
    %cst_20 = arith.constant dense<0.000000e+00> : vector<8x64xf32>
    %35 = tpu.matmul %25, %34, %cst_20 {dimension_numbers = #tpu.dot_dimension_numbers<[1], [0], [0], [1], [0, 0, 1, 1], [], []>} : vector<8x64xbf16>, vector<64x64xbf16>, vector<8x64xf32> -> vector<8x64xf32>
    %36 = vector.broadcast %4 : vector<1x64xf32> to vector<8x64xf32>
    %37 = arith.addf %35, %36 : vector<8x64xf32>
    %38 = vector.extract_strided_slice %29 {offsets = [0, 0], sizes = [8, 16], strides = [1, 1]} : vector<8x64xf32> to vector<8x16xf32>
    %39 = arith.truncf %38 : vector<8x16xf32> to vector<8x16xbf16>
    %40 = vector.extract_strided_slice %33 {offsets = [0, 0], sizes = [8, 16], strides = [1, 1]} : vector<8x64xf32> to vector<8x16xf32>
    %41 = arith.truncf %40 : vector<8x16xf32> to vector<8x16xbf16>
    %42 = vector.extract_strided_slice %37 {offsets = [0, 0], sizes = [8, 16], strides = [1, 1]} : vector<8x64xf32> to vector<8x16xf32>
    %43 = arith.truncf %42 : vector<8x16xf32> to vector<8x16xbf16>
    %cst_21 = arith.constant dense<0.000000e+00> : vector<8x8xf32>
    %44 = tpu.matmul %39, %41, %cst_21 {dimension_numbers = #tpu.dot_dimension_numbers<[1], [1], [0], [0], [0, 0, 1, 0], [], []>} : vector<8x16xbf16>, vector<8x16xbf16>, vector<8x8xf32> -> vector<8x8xf32>
    %cst_22 = arith.constant dense<0xFF800000> : vector<8xf32>
    %45 = vector.multi_reduction <maximumf>, %44, %cst_22 [1] : vector<8x8xf32> to vector<8xf32>
    %46 = vector.shape_cast %45 : vector<8xf32> to vector<8x1xf32>
    %47 = vector.broadcast %46 : vector<8x1xf32> to vector<8x8xf32>
    %48 = arith.subf %44, %47 : vector<8x8xf32>
    %49 = math.exp %48 : vector<8x8xf32>
    %cst_23 = arith.constant dense<0.000000e+00> : vector<8xf32>
    %50 = vector.multi_reduction <add>, %49, %cst_23 [1] : vector<8x8xf32> to vector<8xf32>
    %51 = vector.shape_cast %50 : vector<8xf32> to vector<8x1xf32>
    %52 = vector.broadcast %51 : vector<8x1xf32> to vector<8x8xf32>
    %53 = arith.divf %49, %52 : vector<8x8xf32>
    %54 = arith.truncf %53 : vector<8x8xf32> to vector<8x8xbf16>
    %cst_24 = arith.constant dense<0.000000e+00> : vector<8x16xf32>
    %55 = tpu.matmul %54, %43, %cst_24 {dimension_numbers = #tpu.dot_dimension_numbers<[1], [0], [0], [1], [0, 0, 1, 1], [], []>} : vector<8x8xbf16>, vector<8x16xbf16>, vector<8x16xf32> -> vector<8x16xf32>
    %56 = vector.extract_strided_slice %29 {offsets = [0, 16], sizes = [8, 16], strides = [1, 1]} : vector<8x64xf32> to vector<8x16xf32>
    %57 = arith.truncf %56 : vector<8x16xf32> to vector<8x16xbf16>
    %58 = vector.extract_strided_slice %33 {offsets = [0, 16], sizes = [8, 16], strides = [1, 1]} : vector<8x64xf32> to vector<8x16xf32>
    %59 = arith.truncf %58 : vector<8x16xf32> to vector<8x16xbf16>
    %60 = vector.extract_strided_slice %37 {offsets = [0, 16], sizes = [8, 16], strides = [1, 1]} : vector<8x64xf32> to vector<8x16xf32>
    %61 = arith.truncf %60 : vector<8x16xf32> to vector<8x16xbf16>
    %cst_25 = arith.constant dense<0.000000e+00> : vector<8x8xf32>
    %62 = tpu.matmul %57, %59, %cst_25 {dimension_numbers = #tpu.dot_dimension_numbers<[1], [1], [0], [0], [0, 0, 1, 0], [], []>} : vector<8x16xbf16>, vector<8x16xbf16>, vector<8x8xf32> -> vector<8x8xf32>
    %cst_26 = arith.constant dense<0xFF800000> : vector<8xf32>
    %63 = vector.multi_reduction <maximumf>, %62, %cst_26 [1] : vector<8x8xf32> to vector<8xf32>
    %64 = vector.shape_cast %63 : vector<8xf32> to vector<8x1xf32>
    %65 = vector.broadcast %64 : vector<8x1xf32> to vector<8x8xf32>
    %66 = arith.subf %62, %65 : vector<8x8xf32>
    %67 = math.exp %66 : vector<8x8xf32>
    %cst_27 = arith.constant dense<0.000000e+00> : vector<8xf32>
    %68 = vector.multi_reduction <add>, %67, %cst_27 [1] : vector<8x8xf32> to vector<8xf32>
    %69 = vector.shape_cast %68 : vector<8xf32> to vector<8x1xf32>
    %70 = vector.broadcast %69 : vector<8x1xf32> to vector<8x8xf32>
    %71 = arith.divf %67, %70 : vector<8x8xf32>
    %72 = arith.truncf %71 : vector<8x8xf32> to vector<8x8xbf16>
    %cst_28 = arith.constant dense<0.000000e+00> : vector<8x16xf32>
    %73 = tpu.matmul %72, %61, %cst_28 {dimension_numbers = #tpu.dot_dimension_numbers<[1], [0], [0], [1], [0, 0, 1, 1], [], []>} : vector<8x8xbf16>, vector<8x16xbf16>, vector<8x16xf32> -> vector<8x16xf32>
    %74 = vector.extract_strided_slice %29 {offsets = [0, 32], sizes = [8, 16], strides = [1, 1]} : vector<8x64xf32> to vector<8x16xf32>
    %75 = arith.truncf %74 : vector<8x16xf32> to vector<8x16xbf16>
    %76 = vector.extract_strided_slice %33 {offsets = [0, 32], sizes = [8, 16], strides = [1, 1]} : vector<8x64xf32> to vector<8x16xf32>
    %77 = arith.truncf %76 : vector<8x16xf32> to vector<8x16xbf16>
    %78 = vector.extract_strided_slice %37 {offsets = [0, 32], sizes = [8, 16], strides = [1, 1]} : vector<8x64xf32> to vector<8x16xf32>
    %79 = arith.truncf %78 : vector<8x16xf32> to vector<8x16xbf16>
    %cst_29 = arith.constant dense<0.000000e+00> : vector<8x8xf32>
    %80 = tpu.matmul %75, %77, %cst_29 {dimension_numbers = #tpu.dot_dimension_numbers<[1], [1], [0], [0], [0, 0, 1, 0], [], []>} : vector<8x16xbf16>, vector<8x16xbf16>, vector<8x8xf32> -> vector<8x8xf32>
    %cst_30 = arith.constant dense<0xFF800000> : vector<8xf32>
    %81 = vector.multi_reduction <maximumf>, %80, %cst_30 [1] : vector<8x8xf32> to vector<8xf32>
    %82 = vector.shape_cast %81 : vector<8xf32> to vector<8x1xf32>
    %83 = vector.broadcast %82 : vector<8x1xf32> to vector<8x8xf32>
    %84 = arith.subf %80, %83 : vector<8x8xf32>
    %85 = math.exp %84 : vector<8x8xf32>
    %cst_31 = arith.constant dense<0.000000e+00> : vector<8xf32>
    %86 = vector.multi_reduction <add>, %85, %cst_31 [1] : vector<8x8xf32> to vector<8xf32>
    %87 = vector.shape_cast %86 : vector<8xf32> to vector<8x1xf32>
    %88 = vector.broadcast %87 : vector<8x1xf32> to vector<8x8xf32>
    %89 = arith.divf %85, %88 : vector<8x8xf32>
    %90 = arith.truncf %89 : vector<8x8xf32> to vector<8x8xbf16>
    %cst_32 = arith.constant dense<0.000000e+00> : vector<8x16xf32>
    %91 = tpu.matmul %90, %79, %cst_32 {dimension_numbers = #tpu.dot_dimension_numbers<[1], [0], [0], [1], [0, 0, 1, 1], [], []>} : vector<8x8xbf16>, vector<8x16xbf16>, vector<8x16xf32> -> vector<8x16xf32>
    %92 = vector.extract_strided_slice %29 {offsets = [0, 48], sizes = [8, 16], strides = [1, 1]} : vector<8x64xf32> to vector<8x16xf32>
    %93 = arith.truncf %92 : vector<8x16xf32> to vector<8x16xbf16>
    %94 = vector.extract_strided_slice %33 {offsets = [0, 48], sizes = [8, 16], strides = [1, 1]} : vector<8x64xf32> to vector<8x16xf32>
    %95 = arith.truncf %94 : vector<8x16xf32> to vector<8x16xbf16>
    %96 = vector.extract_strided_slice %37 {offsets = [0, 48], sizes = [8, 16], strides = [1, 1]} : vector<8x64xf32> to vector<8x16xf32>
    %97 = arith.truncf %96 : vector<8x16xf32> to vector<8x16xbf16>
    %cst_33 = arith.constant dense<0.000000e+00> : vector<8x8xf32>
    %98 = tpu.matmul %93, %95, %cst_33 {dimension_numbers = #tpu.dot_dimension_numbers<[1], [1], [0], [0], [0, 0, 1, 0], [], []>} : vector<8x16xbf16>, vector<8x16xbf16>, vector<8x8xf32> -> vector<8x8xf32>
    %cst_34 = arith.constant dense<0xFF800000> : vector<8xf32>
    %99 = vector.multi_reduction <maximumf>, %98, %cst_34 [1] : vector<8x8xf32> to vector<8xf32>
    %100 = vector.shape_cast %99 : vector<8xf32> to vector<8x1xf32>
    %101 = vector.broadcast %100 : vector<8x1xf32> to vector<8x8xf32>
    %102 = arith.subf %98, %101 : vector<8x8xf32>
    %103 = math.exp %102 : vector<8x8xf32>
    %cst_35 = arith.constant dense<0.000000e+00> : vector<8xf32>
    %104 = vector.multi_reduction <add>, %103, %cst_35 [1] : vector<8x8xf32> to vector<8xf32>
    %105 = vector.shape_cast %104 : vector<8xf32> to vector<8x1xf32>
    %106 = vector.broadcast %105 : vector<8x1xf32> to vector<8x8xf32>
    %107 = arith.divf %103, %106 : vector<8x8xf32>
    %108 = arith.truncf %107 : vector<8x8xf32> to vector<8x8xbf16>
    %cst_36 = arith.constant dense<0.000000e+00> : vector<8x16xf32>
    %109 = tpu.matmul %108, %97, %cst_36 {dimension_numbers = #tpu.dot_dimension_numbers<[1], [0], [0], [1], [0, 0, 1, 1], [], []>} : vector<8x8xbf16>, vector<8x16xbf16>, vector<8x16xf32> -> vector<8x16xf32>
    %110 = tpu.concatenate %55, %73, %91, %109 in 1 : vector<8x16xf32>, vector<8x16xf32>, vector<8x16xf32>, vector<8x16xf32> -> vector<8x64xf32>
    %111 = arith.truncf %110 : vector<8x64xf32> to vector<8x64xbf16>
    %c0_37 = arith.constant 0 : index
    %c0_38 = arith.constant 0 : index
    %112 = vector.load %arg7[%c0_37, %c0_38] : memref<64x64xbf16, #tpu.memory_space<vmem>>, vector<64x64xbf16>
    %cst_39 = arith.constant dense<0.000000e+00> : vector<8x64xf32>
    %113 = tpu.matmul %111, %112, %cst_39 {dimension_numbers = #tpu.dot_dimension_numbers<[1], [0], [0], [1], [0, 0, 1, 1], [], []>} : vector<8x64xbf16>, vector<64x64xbf16>, vector<8x64xf32> -> vector<8x64xf32>
    %114 = arith.addf %1, %113 : vector<8x64xf32>
    %115 = vector.broadcast %5 : vector<1x64xf32> to vector<8x64xf32>
    %116 = arith.addf %114, %115 : vector<8x64xf32>
    %cst_40 = arith.constant dense<0.000000e+00> : vector<8xf32>
    %117 = vector.multi_reduction <add>, %116, %cst_40 [1] : vector<8x64xf32> to vector<8xf32>
    %118 = vector.shape_cast %117 : vector<8xf32> to vector<8x1xf32>
    %cst_41 = arith.constant 6.400000e+01 : f32
    %119 = vector.broadcast %cst_41 : f32 to vector<8x1xf32>
    %120 = arith.divf %118, %119 : vector<8x1xf32>
    %121 = vector.broadcast %120 : vector<8x1xf32> to vector<8x64xf32>
    %122 = arith.subf %116, %121 : vector<8x64xf32>
    %123 = arith.mulf %122, %122 : vector<8x64xf32>
    %cst_42 = arith.constant dense<0.000000e+00> : vector<8xf32>
    %124 = vector.multi_reduction <add>, %123, %cst_42 [1] : vector<8x64xf32> to vector<8xf32>
    %125 = vector.shape_cast %124 : vector<8xf32> to vector<8x1xf32>
    %cst_43 = arith.constant 6.400000e+01 : f32
    %126 = vector.broadcast %cst_43 : f32 to vector<8x1xf32>
    %127 = arith.divf %125, %126 : vector<8x1xf32>
    %128 = vector.broadcast %120 : vector<8x1xf32> to vector<8x64xf32>
    %129 = arith.subf %116, %128 : vector<8x64xf32>
    %cst_44 = arith.constant 9.99999974E-6 : f32
    %130 = vector.broadcast %cst_44 : f32 to vector<8x1xf32>
    %131 = arith.addf %127, %130 : vector<8x1xf32>
    %132 = math.rsqrt %131 : vector<8x1xf32>
    %133 = vector.broadcast %132 : vector<8x1xf32> to vector<8x64xf32>
    %134 = arith.mulf %129, %133 : vector<8x64xf32>
    %135 = arith.truncf %134 : vector<8x64xf32> to vector<8x64xbf16>
    %c0_45 = arith.constant 0 : index
    %c0_46 = arith.constant 0 : index
    %136 = vector.load %arg8[%c0_45, %c0_46] : memref<64x256xbf16, #tpu.memory_space<vmem>>, vector<64x256xbf16>
    %cst_47 = arith.constant dense<0.000000e+00> : vector<8x256xf32>
    %137 = tpu.matmul %135, %136, %cst_47 {dimension_numbers = #tpu.dot_dimension_numbers<[1], [0], [0], [1], [0, 0, 1, 1], [], []>} : vector<8x64xbf16>, vector<64x256xbf16>, vector<8x256xf32> -> vector<8x256xf32>
    %c0_48 = arith.constant 0 : index
    %c0_49 = arith.constant 0 : index
    %138 = vector.load %arg3[%c0_48, %c0_49] : memref<1x256xf32, #tpu.memory_space<vmem>>, vector<1x256xf32>
    %139 = vector.broadcast %138 : vector<1x256xf32> to vector<8x256xf32>
    %140 = arith.addf %137, %139 : vector<8x256xf32>
    %cst_50 = arith.constant 1.702000e+00 : f32
    %141 = vector.broadcast %cst_50 : f32 to vector<8x256xf32>
    %142 = arith.mulf %141, %140 : vector<8x256xf32>
    %143 = arith.negf %142 : vector<8x256xf32>
    %144 = math.exp %143 : vector<8x256xf32>
    %cst_51 = arith.constant 1.000000e+00 : f32
    %145 = vector.broadcast %cst_51 : f32 to vector<8x256xf32>
    %146 = arith.addf %145, %144 : vector<8x256xf32>
    %147 = arith.divf %145, %146 : vector<8x256xf32>
    %148 = arith.mulf %140, %147 : vector<8x256xf32>
    %149 = arith.truncf %148 : vector<8x256xf32> to vector<8x256xbf16>
    %c0_52 = arith.constant 0 : index
    %c0_53 = arith.constant 0 : index
    %150 = vector.load %arg9[%c0_52, %c0_53] : memref<256x64xbf16, #tpu.memory_space<vmem>>, vector<256x64xbf16>
    %cst_54 = arith.constant dense<0.000000e+00> : vector<8x64xf32>
    %151 = tpu.matmul %149, %150, %cst_54 {dimension_numbers = #tpu.dot_dimension_numbers<[1], [0], [0], [1], [0, 0, 1, 1], [], []>} : vector<8x256xbf16>, vector<256x64xbf16>, vector<8x64xf32> -> vector<8x64xf32>
    %152 = arith.addf %116, %151 : vector<8x64xf32>
    %153 = vector.broadcast %6 : vector<1x64xf32> to vector<8x64xf32>
    %154 = arith.addf %152, %153 : vector<8x64xf32>
    %c0_55 = arith.constant 0 : index
    %c0_56 = arith.constant 0 : index
    %c0_57 = arith.constant 0 : index
    %155 = vector.load %arg10[%c0_55, %c0_56, %c0_57] : memref<1x8x64xf32, #tpu.memory_space<vmem>>, vector<1x8x64xf32>
    %156 = vector.shape_cast %155 : vector<1x8x64xf32> to vector<8x64xf32>
    %157 = vector.shape_cast %154 : vector<8x64xf32> to vector<1x8x64xf32>
    tpu.vector_store %arg10[%c0_55, %c0_56, %c0_57], %157 {strides = array<i32>} : memref<1x8x64xf32, #tpu.memory_space<vmem>>, vector<1x8x64xf32>,
    return
  }
  func.func @transform_0(%arg0: i32) -> (i32, i32, i32) {
    %c0_i32 = arith.constant 0 : i32
    %c0_i32_0 = arith.constant 0 : i32
    %c0_i32_1 = arith.constant 0 : i32
    return %arg0, %c0_i32, %c0_i32_0 : i32, i32, i32
  }
  func.func @transform_1(%arg0: i32) -> (i32, i32) {
    %c0_i32 = arith.constant 0 : i32
    %c0_i32_0 = arith.constant 0 : i32
    %c0_i32_1 = arith.constant 0 : i32
    return %c0_i32, %c0_i32_0 : i32, i32
  }
  func.func @transform_2(%arg0: i32) -> (i32, i32) {
    %c0_i32 = arith.constant 0 : i32
    %c0_i32_0 = arith.constant 0 : i32
    %c0_i32_1 = arith.constant 0 : i32
    return %c0_i32, %c0_i32_0 : i32, i32
  }
  func.func @transform_3(%arg0: i32) -> (i32, i32) {
    %c0_i32 = arith.constant 0 : i32
    %c0_i32_0 = arith.constant 0 : i32
    %c0_i32_1 = arith.constant 0 : i32
    return %c0_i32, %c0_i32_0 : i32, i32
  }
  func.func @transform_4(%arg0: i32) -> (i32, i32) {
    %c0_i32 = arith.constant 0 : i32
    %c0_i32_0 = arith.constant 0 : i32
    %c0_i32_1 = arith.constant 0 : i32
    return %c0_i32, %c0_i32_0 : i32, i32
  }
  func.func @transform_5(%arg0: i32) -> (i32, i32) {
    %c0_i32 = arith.constant 0 : i32
    %c0_i32_0 = arith.constant 0 : i32
    %c0_i32_1 = arith.constant 0 : i32
    return %c0_i32, %c0_i32_0 : i32, i32
  }
  func.func @transform_6(%arg0: i32) -> (i32, i32) {
    %c0_i32 = arith.constant 0 : i32
    %c0_i32_0 = arith.constant 0 : i32
    %c0_i32_1 = arith.constant 0 : i32
    return %c0_i32, %c0_i32_0 : i32, i32
  }
  func.func @transform_7(%arg0: i32) -> (i32, i32) {
    %c0_i32 = arith.constant 0 : i32
    %c0_i32_0 = arith.constant 0 : i32
    %c0_i32_1 = arith.constant 0 : i32
    return %c0_i32, %c0_i32_0 : i32, i32
  }
  func.func @transform_8(%arg0: i32) -> (i32, i32) {
    %c0_i32 = arith.constant 0 : i32
    %c0_i32_0 = arith.constant 0 : i32
    %c0_i32_1 = arith.constant 0 : i32
    return %c0_i32, %c0_i32_0 : i32, i32
  }
  func.func @transform_9(%arg0: i32) -> (i32, i32, i32) {
    %c0_i32 = arith.constant 0 : i32
    %c0_i32_0 = arith.constant 0 : i32
    %c0_i32_1 = arith.constant 0 : i32
    return %arg0, %c0_i32, %c0_i32_0 : i32, i32, i32
  }
}

</mosaic_0001>

<bundles_post_ra>
// kernel: tpu_custom_call.1
= control target key start
LH: loop header
LB: loop body
LE: loop exit
PB: predicated region body
PF: predicated region fallthrough
CT: control target
= control target key end

     0   :  { %s2515_s0 = inlined_call_operand.hbm [shape: f32[2,8,64], index: 0, kind: input, shape index: {}]   ;;  %s2516_s1 = inlined_call_operand.hbm [shape: f32[8,64], index: 1, kind: input, shape index: {}]   ;;  %s2517_s2 = inlined_call_operand.vmem [shape: f32[1,256], index: 2, kind: input, shape index: {}]   ;;  %s2518_s3 = inlined_call_operand.vmem [shape: bf16[64,64], index: 3, kind: input, shape index: {}]   ;;  %s2519_s4 = inlined_call_operand.vmem [shape: bf16[64,64], index: 4, kind: input, shape index: {}]   ;;  %s2520_s5 = inlined_call_operand.vmem [shape: bf16[64,64], index: 5, kind: input, shape index: {}]   ;;  %s2521_s6 = inlined_call_operand.vmem [shape: bf16[64,64], index: 6, kind: input, shape index: {}]   ;;  %s2522_s7 = inlined_call_operand.vmem [shape: bf16[64,256], index: 7, kind: input, shape index: {}]   ;;  %s2523_s8 = inlined_call_operand.vmem [shape: bf16[256,64], index: 8, kind: input, shape index: {}]   ;;  %s2524_s9 = inlined_call_operand.hbm [shape: f32[2,8,64], index: 9, kind: output, shape index: {}]  }
   0x1   :  { %2532 = sst [smem:[#allocation14_spill]] %s2516_s1 }
   0x2   :  { %14 = vsyncpa [#allocation3], 0 }
   0x3   :  { %16 = vsyncpa [#allocation3 + $0x1], 0 }
   0x4   :  { %17 = vsyncpa [#allocation6], 0 }
   0x5   :  { %18 = vsyncpa [#allocation4], 0 }
   0x6   :  { %20 = vsyncpa [#allocation4 + $0x1], 0  ;;  %s2114_s30 = smov 0   ;;  %s2116_s10 = smov 0  }
   0x7   :  { %s2118_s11 = smov 0   ;;  %s2120_s12 = smov 0  }
   0x8 LB: > { %2533 = sst [smem:[#allocation11_spill]] %s2046_s11  ;;  %s2135_s13 = sadd.s32 4294967295, %s2050_s12   ;;  %s2050_s12 = sphi %s2120_s12, %s2552_s12   ;;  %s2046_s11 = sphi %s2118_s11, %s2554_s11   ;;  %s2042_s10 = sphi %s2116_s10, %s2556_s10   ;;  %s2038_s30 = sphi %s2114_s30, %s2555_s30  }
   0x9   : > { %s1562_s14 = sadd.s32 4294967294, %s2050_s12   ;;  %p46_p0 = scmp.ne.s32.totalorder %s2042_s10, %s2038_s30 }
   0xa   : > { %p2525_p1 = scmp.eq.s32.totalorder %s2135_s13, 0  ;;  %p244_p3 = scmp.eq.s32.totalorder %s1562_s14, 1 }
   0xb   : > { %p1563_p5 = scmp.ge.s32.totalorder %s2050_s12, 1  ;;  %p251_p7 = scmp.lt.s32.totalorder %s2050_s12, 3 }
   0xc   : > { %p2144_p4 = por %p2525_p1, %p46_p0  ;;  %p2149_p6 = por %p244_p3, %p46_p0 }
   0xd   : > { %p2154_p8 = pnand %p1563_p5, %p251_p7  ;;  %s2052_s18 = smov [#allocation5]  }
   0xe   : > { %s2534_s15 = scalar_select %p2144_p4, 1, 0 }
   0xf   : > { %s2535_s16 = scalar_select %p2149_p6, 1, 0 }
  0x10   : > { %s2536_s17 = scalar_select %p2154_p8, 1, 0 }
  0x11   : > { %s264_s19 = sshll.u32 %s2052_s18, 4  ;;  %p1798_p10 = pneg %p2154_p8  ;;  %s265_s19 = int_to_ptr.vmem [resolvable:$true] %s264_s19 }
  0x12   : > { %s2162_s20 = sadd.s32 1, %s2050_s12   ;;  %s33_s24 = sadd.s32 1, %s2046_s11 }
  0x13   : > { %2537 = sst [smem:[#allocation12_spill]] %s2162_s20  ;;  %p2166_p11 = pnand %p1798_p10, %p2525_p1 }
  0x14   : > { %s30_s22 = ssub.s32 %s2050_s12, %s2162_s20  ;;  %p40_p13 = scmp.ne.s32.totalorder %s2046_s11, %s2042_s10 }
  0x15   : > { %p2172_p12 = scmp.eq.s32.totalorder %s30_s22, 0  ;;  %p1930_p0 = pneg %p2166_p11 }
  0x16   : > { %s1939_s25 = scalar_lea.vmem %s265_s19, 128  ;;  %p1947_p9 = scmp.lt.s32.totalorder %s265_s19, %s265_s19 }
  0x17   : > { %p1940_p3 = scmp.ne.s32.totalorder %s265_s19, %s1939_s25  ;;  %p1948_p2 = scmp.lt.s32.totalorder %s1939_s25, %s1939_s25 }
  0x19   : > { %p1942_p5 = pnand %p1940_p3, %p1930_p0  ;;  %p1949_p10 = por %p1948_p2, %p1947_p9 }
  0x1b   : > { %p1943_p7 = pneg %p1942_p5 }
  0x1d   : > { %p1950_p1 = pnand %p1949_p10, %p1943_p7 }
  0x1f   : > { %1953 = shalt.err (!%p1950_p1)
}
  0x20   : > { %s2540_s1 = sld [smem:[#allocation14_spill]]  ;;  %p41_p1 = scmp.eq.s32.totalorder %s2050_s12, 0 }
  0x21   : > { %s2189_s28 = scalar_select %p2172_p12, %s2046_s11, %s33_s24  }
  0x22   : > { %p2542_p2 = scmp.eq.s32.totalorder %s2135_s13, 1  ;;  %p1811_p0 = scmp.lt.s32.totalorder %s2050_s12, 2 }
  0x23   : > { %2541 = sst [smem:[#allocation13_spill]] %s2189_s28  ;;  %s296_s14 = sand.u32 1, %s2046_s11  }
  0x24   : > { %p2197_p9 = por %p2542_p2, %p40_p13  ;;  %p42_p3 = por %p41_p1, %p40_p13 }
  0x25   : > { %s1566_s18 = sshll.u32 %s296_s14, 3  ;;  %s1567_s21 = sshll.u32 %s2050_s12, 7 }
  0x26   : > { %1801 = dma.hbm_to_vmem [thread:$0]  (!%p2166_p11), %s2540_s1, 128, %s265_s19, [#allocation6]  }
  0x27   : > { %s2543_s29 = scalar_select %p2197_p9, 1, 0 }
  0x28   : > { %s2210_s19 = scalar_lea.hbm %s2515_s0, %s1567_s21  ;;  %s300_s23 = scalar_lea.vmem [#allocation2], %s1566_s18 }
  0x29   : > { %s307_s24 = sshll.u32 %s300_s23, 4  ;;  %p2212_p11 = pnand %p1811_p0, %p42_p3  ;;  %s308_s24 = int_to_ptr.vmem [resolvable:$true] %s307_s24 }
  0x2a   : > { %s297_s27 = scalar_lea.sflag [#allocation3], %s296_s14  ;;  %s1954_s1 = scalar_lea.hbm %s2210_s19, 128 }
  0x2b   : > { %p1955_p12 = scmp.ne.s32.totalorder %s2210_s19, %s1954_s1  ;;  %p1956_p13 = pneg %p2212_p11 }
  0x2c   : > { %s1959_s25 = scalar_lea.hbm %s2515_s0, 256  ;;  %p1960_p10 = scmp.lt.s32.totalorder %s2210_s19, %s2515_s0 }
  0x2d   : > { %p1957_p5 = pnand %p1956_p13, %p1955_p12  ;;  %p1961_p1 = scmp.lt.s32.totalorder %s1959_s25, %s1954_s1 }
  0x2f   : > { %p1958_p7 = pneg %p1957_p5  ;;  %p1962_p2 = por %p1961_p1, %p1960_p10 }
  0x31   : > { %p1963_p0 = pnand %p1962_p2, %p1958_p7 }
  0x33   : > { %1966 = shalt.err (!%p1963_p0)
}
  0x34   : > { %s1967_s23 = scalar_lea.vmem %s308_s24, 128  ;;  %s2053_s14 = smov [#allocation2]  }
  0x35   : > { %p1968_p3 = scmp.ne.s32.totalorder %s308_s24, %s1967_s23  ;;  %s1972_s11 = sshll.u32 %s2053_s14, 4  ;;  %s1973_s11 = int_to_ptr.vmem [resolvable:$false] %s1972_s11 }
  0x36   : > { %s1974_s20 = scalar_lea.vmem %s1973_s11, 256  ;;  %p1975_p12 = scmp.lt.s32.totalorder %s308_s24, %s1973_s11 }
  0x37   : > { %p1970_p6 = pnand %p1968_p3, %p1956_p13  ;;  %p1976_p5 = scmp.lt.s32.totalorder %s1974_s20, %s1967_s23 }
  0x39   : > { %p1971_p9 = pneg %p1970_p6  ;;  %p1977_p4 = por %p1976_p5, %p1975_p12 }
  0x3b   : > { %p1978_p8 = pnand %p1977_p4, %p1971_p9 }
  0x3d   : > { %1981 = shalt.err (!%p1978_p8)
}
  0x3e   : > { %1805 = dma.hbm_to_vmem [thread:$0]  (!%p2212_p11), %s2210_s19, 128, %s308_s24, %s297_s27  }
  0x3f   : > { %p2545_p7 = scmp.ne.s32.totalorder %s2536_s17, 0 }
  0x40   : > { %s2233_s1 = sand.u32 (!%p2545_p7), 1, %s2042_s10   ;;  %p2546_p4 = scmp.ne.s32.totalorder (!%p2545_p7), %s2534_s15, 0 }
  0x41   : > { %316 = sbr.rel (%p2545_p7) target bundleno = 2541 (0x9ed), region = 56  ;;  %s1569_s28 = sshll.u32 (!%p2545_p7), %s2233_s1, 3 }
  0x42   : > { %s319_s11 = scalar_lea.sflag (!%p2545_p7), [#allocation3], %s2233_s1  ;;  %s322_s20 = scalar_lea.vmem (!%p2545_p7), [#allocation2], %s1569_s28 }
  0x46   : > { %2025 = dma.done.wait (%p2546_p4), %s319_s11, 128  }
  0x47   : > { %2027 = vsyncadd (%p2546_p4), %s319_s11, 4294967168  ;;  %p2547_p6 = scmp.eq.s32.totalorder %s2135_s13, 0 }
  0x49   : > { %2029 = dma.done.wait (%p2547_p6), [#allocation6], 128   ;;  %p2548_p8 = pmov %p2547_p6 }
  0x4a   : > { %vm368_vm0 = vcmask 523264   ;;  %v2247_v0 = vld [vmem:[%s322_s20] sm:$0xff]  ;;  %v1856_v7 = vld [vmem:[%s2518_s3 + $0x18] sm:$0xff]   ;;  %v2054_v9 = vmov 0.0   ;;  %v1858_v10 = vld [vmem:[%s2518_s3 + $0x10] sm:$0xff]   ;;  %vm2055_vm1 = vmmov 0  }
  0x4b   : > { %2031 = vsyncadd (%p2548_p8), [#allocation6], 4294967168  ;;  %v369_v1 = vsel %vm368_vm0, %v2247_v0, 0.0  ;;  %v1857_v8 = vld [vmem:[%s2520_s5 + $0x18] sm:$0xff]   ;;  %1694 = vmatprep.subr.bf16.mxu1 %v2054_v9  ;;  %1718 = vmatprep.subr.bf16.mxu0 %v2054_v9  ;;  %v1859_v11 = vld [vmem:[%s2520_s5 + $0x10] sm:$0xff]   ;;  %vm618_vm2 = vcmask 130048  }
  0x4c   : > { %370 = vadd.xlane.f32.xlu0 %v369_v1  ;;  %1695 = vmatpush3.bf16.msra.mxu1 %v1856_v7  ;;  %v1860_v12 = vld [vmem:[%s2518_s3 + $0x8] sm:$0xff]   ;;  %v1862_v14 = vld [vmem:[%s2518_s3] sm:$0xff]   ;;  %v1864_v21 = vld [vmem:[%s2519_s4 + $0x18] sm:$0xff]   ;;  %s2056_s23 = smov 96   ;;  %s2057_s14 = smov 112   ;;  %vm681_vm3 = vcmask 1043456  }
  0x4d   : > { %1719 = vmatpush3.bf16.msra.mxu0 %v1857_v8  ;;  %1696 = vmatprep.subr.bf16.mxu1 %v2054_v9  ;;  %v1861_v13 = vld [vmem:[%s2520_s5 + $0x8] sm:$0xff]   ;;  %v1863_v15 = vld [vmem:[%s2520_s5] sm:$0xff]   ;;  %v1865_v23 = vld [vmem:[%s2519_s4 + $0x10] sm:$0xff]   ;;  %s2058_s11 = smov 80   ;;  %vm665_vm4 = vcmask 64512   ;;  %s2059_s24 = smov 16  }
  0x4e   : > { %1720 = vmatprep.subr.bf16.mxu0 %v2054_v9  ;;  %1702 = vmatprep.mubr.msk.bf16.mxu1 %vm2055_vm1, %v2054_v9  ;;  %v1866_v24 = vld [vmem:[%s2519_s4 + $0x8] sm:$0xff]   ;;  %v1867_v25 = vld [vmem:[%s2519_s4] sm:$0xff]   ;;  %v1578_v34 = vld [vmem:[#allocation5 + $0x1] ss:$0 sm:$0xff]  ;;  %s2060_s21 = smov 32   ;;  %s2061_s18 = smov 48  }
  0x4f   : > { %1726 = vmatprep.mubr.msk.bf16.mxu0 %vm2055_vm1, %v2054_v9  ;;  %v1572_v35 = vld [vmem:[#allocation5] ss:$0 sm:$0xff]  ;;  %v1584_v38 = vld [vmem:[#allocation5 + $0x2] ss:$0 sm:$0xff]  ;;  %vm1071_vm5 = vcmask 261120   ;;  %vm1073_vm6 = vcmask 392192  }
  0x50   : > { %1697 = vmatpush3.bf16.msra.mxu1 %v1858_v10  ;;  %s1633_s26 = sshll.u32 %s2135_s13, 7  ;;  %s360_s27 = scalar_lea.vmem [#allocation7], %s1569_s28 }
  0x51   : > { %1721 = vmatpush3.bf16.msra.mxu0 %v1859_v11  ;;  %1698 = vmatprep.subr.bf16.mxu1 %v2054_v9  ;;  %p2549_p11 = scmp.ne.s32.totalorder %s2543_s29, 0  ;;  %s2063_s13 = smov [#allocation7]  }
  0x52   : > { %1722 = vmatprep.subr.bf16.mxu0 %v2054_v9  ;;  %s1986_s28 = sshll.u32 %s2063_s13, 4  ;;  %s1987_s28 = int_to_ptr.vmem [resolvable:$false] %s1986_s28 }
  0x54   : > { %1699 = vmatpush3.bf16.msra.mxu1 %v1860_v12 }
  0x55   : > { %1723 = vmatpush3.bf16.msra.mxu0 %v1861_v13  ;;  %1700 = vmatprep.subr.bf16.mxu1 %v2054_v9 }
  0x56   : > { %1724 = vmatprep.subr.bf16.mxu0 %v2054_v9 }
  0x58   : > { %1701 = vmatpush3.bf16.msra.mxu1 %v1862_v14 }
  0x59   : > { %1725 = vmatpush3.bf16.msra.mxu0 %v1863_v15  ;;  %1706 = vmatprep.subr.bf16.mxu1 %v2054_v9 }
  0x5a   : > { %1742 = vmatprep.subr.bf16.mxu0 %v2054_v9 }
  0xd5   : > { %v371_v2 = vpop.xlane.xlu0 %370 }
  0xd6   : > { %v373_v3 = vmul.f32 0.015625, %v371_v2 }
  0xd8   : > { %v374_v4 = vsub.f32 %v2247_v0, %v373_v3 }
  0xda   : > { %v375_v5 = vmul.f32 %v374_v4, %v374_v4 }
  0xdc   : > { %v376_v6 = vsel %vm368_vm0, %v375_v5, 0.0 }
  0xdd   : > { %377 = vadd.xlane.f32.xlu0 %v376_v6 }
 0x166   : > { %v378_v16 = vpop.xlane.xlu0 %377 }
 0x167   : > { %v379_v17 = vmul.f32 0.015625, %v378_v16 }
 0x169   : > { %v380_v18 = vadd.f32 1e-05, %v379_v17 }
 0x16b   : > { %1900 = vrsqrt.f32 %v380_v18 }
 0x178   : > { %v1901_v19 = vpop.eup %1900 }
 0x179   : > { %v382_v20 = vmul.f32 %v1901_v19, %v374_v4 }
 0x17b   : > { %v383_v22 = vpack.c.bf16 %v382_v20, %v382_v20 }
 0x17d   : > { %1703 = vmatmul.mubr.msk.bf16.vlgmr.msra.gmra.mxu1 %vm368_vm0, %v383_v22  ;;  %1727 = vmatmul.mubr.msk.bf16.vlgmr.msra.gmra.mxu0 %vm368_vm0, %v383_v22 }
 0x17e   : > { %1707 = vmatpush3.bf16.msra.mxu1 %v1864_v21  ;;  %1714 = vmatprep.mubr.msk.bf16.mxu1 %vm2055_vm1, %v2054_v9 }
 0x17f   : > { %1708 = vmatprep.subr.bf16.mxu1 %v2054_v9  ;;  %1744 = vmatprep.mubr.msk.bf16.mxu0 %vm2055_vm1, %v2054_v9 }
 0x182   : > { %1709 = vmatpush3.bf16.msra.mxu1 %v1865_v23 }
 0x183   : > { %1710 = vmatprep.subr.bf16.mxu1 %v2054_v9 }
 0x186   : > { %1711 = vmatpush3.bf16.msra.mxu1 %v1866_v24 }
 0x187   : > { %1712 = vmatprep.subr.bf16.mxu1 %v2054_v9 }
 0x18a   : > { %1713 = vmatpush3.bf16.msra.mxu1 %v1867_v25 }
 0x18b   : > { %1730 = vmatprep.subr.bf16.mxu1 %v2054_v9 }
 0x18d   : > { %1715 = vmatmul.mubr.msk.bf16.vlgmr.msra.gmra.mxu1 %vm368_vm0, %v383_v22 }
 0x18e   : > { %1732 = vmatprep.mubr.msk.bf16.mxu1 %vm2055_vm1, %v2054_v9 }
 0x23d   : > { %v457_v26 = vpop.f32.mrf.mxu1  ;;  %v609_v27 = vpop.f32.mrf.mxu0 }
 0x23e   : > { %v458_v40 = vadd.f32 %v1572_v35, %v457_v26  ;;  %v610_v43 = vadd.f32 %v1584_v38, %v609_v27 }
 0x23f   : > { %v1704_v28 = vpop.f32.mrf.mxu1  ;;  %v1728_v29 = vpop.f32.mrf.mxu0 }
 0x240   : > { %v615_v46 = vpack.c.bf16 %v458_v40, %v458_v40  ;;  %v2320_v47 = vpack.c.bf16 %v610_v43, %v610_v43 }
 0x241   : > { %v460_v30 = vpop.f32.mrf.mxu1  ;;  %v612_v31 = vpop.f32.mrf.mxu0 }
 0x242   : > { %v683_v48 = vsel %vm681_vm3, %v2320_v47, 0 }
 0x243   : > { %v1705_v32 = vpop.f32.mrf.mxu1  ;;  %v1729_v33 = vpop.f32.mrf.mxu0 }
 0x24d   : > { %v533_v36 = vpop.f32.mrf.mxu1 }
 0x24e   : > { %v534_v37 = vadd.f32 %v1578_v34, %v533_v36 }
 0x24f   : > { %v1716_v39 = vpop.f32.mrf.mxu1 }
 0x250   : > { %v616_v41 = vpack.c.bf16 %v534_v37, %v534_v37 }
 0x251   : > { %v536_v42 = vpop.f32.mrf.mxu1 }
 0x252   : > { %840 = vrot.lane.b32.xlu0 %v616_v41, %s2056_s23  ;;  %729 = vrot.lane.b32.xlu1 %v616_v41, %s2057_s14  ;;  %v623_v44 = vsel %vm618_vm2, %v616_v41, 0 }
 0x253   : > { %v1717_v45 = vpop.f32.mrf.mxu1  ;;  %1731 = vmatpush3.bf16.xpose.msra.mxu1 %v623_v44 }
 0x254   : > { %1736 = vmatprep.subr.bf16.mxu1 %v2054_v9 }
 0x256   : > { %726 = vrot.lane.b32.xlu1 %v615_v46, %s2057_s14 }
 0x25a   : > { %838 = vrot.lane.b32.xlu1 %v615_v46, %s2056_s23  ;;  %1733 = vmatmul.mubr.msk.bf16.vlgmr.msra.gmra.mxu1 %vm618_vm2, %v615_v46 }
 0x25b   : > { %1737 = vmatpush3.bf16.msra.mxu1 %v683_v48  ;;  %1738 = vmatprep.mubr.msk.bf16.mxu1 %vm2055_vm1, %v2054_v9 }
 0x25c   : > { %1748 = vmatprep.subr.bf16.mxu1 %v2054_v9 }
 0x25e   : > { %950 = vrot.lane.b32.xlu1 %v616_v41, %s2058_s11 }
 0x262   : > { %948 = vrot.lane.b32.xlu1 %v615_v46, %s2058_s11 }
 0x2c4   : > { %v730_v49 = vpop.permute.xlu1 %729  ;;  %v841_v52 = vpop.permute.xlu0 %840 }
 0x2c5   : > { %v735_v50 = vsel %vm618_vm2, %v730_v49, 0  ;;  %v846_v54 = vsel %vm618_vm2, %v841_v52, 0 }
 0x2c6   : > { %1743 = vmatpush3.bf16.xpose.msra.mxu0 %v735_v50 }
 0x2c7   : > { %1754 = vmatprep.subr.bf16.mxu0 %v2054_v9 }
 0x2c8   : > { %v727_v51 = vpop.permute.xlu1 %726 }
 0x2cc   : > { %v839_v53 = vpop.permute.xlu1 %838 }
 0x2cd   : > { %1745 = vmatmul.mubr.msk.bf16.vlgmr.msra.gmra.mxu0 %vm618_vm2, %v727_v51 }
 0x2ce   : > { %1755 = vmatpush3.bf16.xpose.msra.mxu0 %v846_v54  ;;  %1756 = vmatprep.mubr.msk.bf16.mxu0 %vm2055_vm1, %v2054_v9 }
 0x2cf   : > { %1766 = vmatprep.subr.bf16.mxu0 %v2054_v9 }
 0x2d0   : > { %v951_v55 = vpop.permute.xlu1 %950 }
 0x2d1   : > { %v956_v56 = vsel %vm618_vm2, %v951_v55, 0 }
 0x2d4   : > { %v949_v57 = vpop.permute.xlu1 %948 }
 0x2d5   : > { %1757 = vmatmul.mubr.msk.bf16.vlgmr.msra.gmra.mxu0 %vm618_vm2, %v839_v53 }
 0x2d6   : > { %1767 = vmatpush3.bf16.xpose.msra.mxu0 %v956_v56  ;;  %1768 = vmatprep.mubr.msk.bf16.mxu0 %vm2055_vm1, %v2054_v9 }
 0x2d7   : > { %1778 = vmatprep.subr.bf16.mxu0 %v2054_v9 }
 0x2dd   : > { %1769 = vmatmul.mubr.msk.bf16.vlgmr.msra.gmra.mxu0 %vm618_vm2, %v949_v57 }
 0x2de   : > { %1786 = vmatprep.mubr.msk.bf16.mxu0 %vm2055_vm1, %v2054_v9 }
 0x31a   : > { %v659_v58 = vpop.f32.mrf.mxu1 }
 0x31b   : > { %v666_v59 = vsel %vm665_vm4, %v659_v58, -inf }
 0x31c   : > { %667 = vmax.xlane.f32.xlu1 %v666_v59  ;;  %v1734_v60 = vpop.f32.mrf.mxu1 }
 0x31e   : > { %v662_v61 = vpop.f32.mrf.mxu1 }
 0x320   : > { %v1735_v62 = vpop.f32.mrf.mxu1 }
 0x321   : > { %v1868_v62 = vld [vmem:[%s2521_s6 + $0x18] sm:$0xff]  }
 0x322   : > { %1779 = vmatpush3.bf16.msra.mxu0 %v1868_v62  ;;  %v1897_v62 = vld [vmem:[%s2523_s8 + $0x8] sm:$0xff]  }
 0x323   : > { %1780 = vmatprep.subr.bf16.mxu0 %v2054_v9 }
 0x38d   : > { %v771_v63 = vpop.f32.mrf.mxu0 }
 0x38e   : > { %v777_v1 = vsel %vm665_vm4, %v771_v63, -inf }
 0x38f   : > { %778 = vmax.xlane.f32.xlu0 %v777_v1  ;;  %v1746_v2 = vpop.f32.mrf.mxu0 }
 0x391   : > { %v774_v3 = vpop.f32.mrf.mxu0 }
 0x392   : > { %v1870_v3 = vld [vmem:[%s2521_s6 + $0x8] sm:$0xff]  }
 0x393   : > { %v1747_v4 = vpop.f32.mrf.mxu0 }
 0x395   : > { %v882_v5 = vpop.f32.mrf.mxu0 }
 0x396   : > { %v888_v6 = vsel %vm665_vm4, %v882_v5, -inf }
 0x397   : > { %v1758_v7 = vpop.f32.mrf.mxu0  ;;  %889 = vmax.xlane.f32.xlu1 %v888_v6 }
 0x399   : > { %v885_v8 = vpop.f32.mrf.mxu0 }
 0x39b   : > { %v1759_v10 = vpop.f32.mrf.mxu0 }
 0x39d   : > { %v992_v11 = vpop.f32.mrf.mxu0 }
 0x39e   : > { %v998_v12 = vsel %vm665_vm4, %v992_v11, -inf }
 0x39f   : > { %v1770_v13 = vpop.f32.mrf.mxu0  ;;  %999 = vmax.xlane.f32.xlu1 %v998_v12 }
 0x3a1   : > { %v995_v14 = vpop.f32.mrf.mxu0 }
 0x3a3   : > { %v1771_v15 = vpop.f32.mrf.mxu0 }
 0x3a5   : > { %v668_v16 = vpop.xlane.xlu1 %667 }
 0x3a6   : > { %v669_v17 = vsub.f32 %v659_v58, %v668_v16 }
 0x3a8   : > { %v670_v18 = vmul.f32 1.442695, %v669_v17 }
 0x3aa   : > { %1902 = vpow2.f32 %v670_v18 }
 0x3b7   : > { %v1903_v19 = vpop.eup %1902 }
 0x3b8   : > { %v672_v20 = vsel %vm665_vm4, %v1903_v19, 0.0 }
 0x3b9   : > { %673 = vadd.xlane.f32.xlu0 %v672_v20 }
 0x418   : > { %v779_v21 = vpop.xlane.xlu0 %778 }
 0x419   : > { %v780_v22 = vsub.f32 %v771_v63, %v779_v21  ;;  %v1869_v63 = vld [vmem:[%s2521_s6 + $0x10] sm:$0xff]  }
 0x41a   : > { %1781 = vmatpush3.bf16.msra.mxu0 %v1869_v63  ;;  %v1898_v63 = vld [vmem:[%s2523_s8 + $0x40] sm:$0xff]  }
 0x41b   : > { %v781_v23 = vmul.f32 1.442695, %v780_v22  ;;  %1782 = vmatprep.subr.bf16.mxu0 %v2054_v9  ;;  %v1603_v22 = vld [vmem:[#allocation5 + $0x3] ss:$0 sm:$0xff] }
 0x41d   : > { %1904 = vpow2.f32 %v781_v23 }
 0x41e   : > { %1783 = vmatpush3.bf16.msra.mxu0 %v1870_v3 }
 0x41f   : > { %1784 = vmatprep.subr.bf16.mxu0 %v2054_v9 }
 0x420   : > { %v890_v24 = vpop.xlane.xlu1 %889 }
 0x421   : > { %v891_v25 = vsub.f32 %v882_v5, %v890_v24 }
 0x423   : > { %v892_v26 = vmul.f32 1.442695, %v891_v25 }
 0x425   : > { %1906 = vpow2.f32 %v892_v26 }
 0x428   : > { %v1000_v32 = vpop.xlane.xlu1 %999 }
 0x429   : > { %v1001_v33 = vsub.f32 %v992_v11, %v1000_v32  ;;  %v1871_v11 = vld [vmem:[%s2521_s6] sm:$0xff]  }
 0x42a   : > { %v1905_v27 = vpop.eup %1904  ;;  %1785 = vmatpush3.bf16.msra.mxu0 %v1871_v11 }
 0x42b   : > { %v783_v28 = vsel %vm665_vm4, %v1905_v27, 0.0  ;;  %v1002_v34 = vmul.f32 1.442695, %v1001_v33 }
 0x42c   : > { %784 = vadd.xlane.f32.xlu1 %v783_v28 }
 0x432   : > { %v1907_v29 = vpop.eup %1906 }
 0x433   : > { %v894_v30 = vsel %vm665_vm4, %v1907_v29, 0.0 }
 0x434   : > { %895 = vadd.xlane.f32.xlu0 %v894_v30 }
 0x43d   : > { %900 = vrot.lane.b32.xlu1 %v2320_v47, %s2056_s23  ;;  %s1469_s23 = scalar_lea.sflag [#allocation4], %s2233_s1 }
 0x442   : > { %v674_v31 = vpop.xlane.xlu0 %673 }
 0x443   : > { %1908 = vrcp.f32 %v674_v31 }
 0x444   : > { %1910 = vpow2.f32 %v1002_v34 }
 0x44a   : > { %790 = vrot.lane.b32.xlu0 %v2320_v47, %s2057_s14 }
 0x450   : > { %v1909_v35 = vpop.eup %1908 }
 0x451   : > { %v676_v36 = vmul.f32 %v1909_v35, %v1903_v19  ;;  %v1911_v38 = vpop.eup %1910  ;;  %v1874_v35 = vld [vmem:[%s2522_s7 + $0x34] ss:$8 sps:$4 sm:$0xff]  }
 0x452   : > { %v1004_v39 = vsel %vm665_vm4, %v1911_v38, 0.0 }
 0x453   : > { %v677_v37 = vpack.c.bf16 %v676_v36, %v676_v36  ;;  %v1877_v36 = vld [vmem:[%s2522_s7 + $0x24] ss:$8 sps:$4 sm:$0xff]  }
 0x455   : > { %1739 = vmatmul.mubr.msk.bf16.vlgmr.msra.gmra.mxu1 %vm665_vm4, %v677_v37  ;;  %v1875_v37 = vld [vmem:[%s2522_s7 + $0x20] ss:$8 sps:$4 sm:$0xff]  }
 0x456   : > { %1750 = vmatprep.mubr.msk.bf16.mxu1 %vm2055_vm1, %v2054_v9 }
 0x461   : > { %1005 = vadd.xlane.f32.xlu1 %v1004_v39  ;;  %v1880_v39 = vld [vmem:[%s2522_s7 + $0x14] ss:$8 sps:$4 sm:$0xff]  }
 0x472   : > { %1010 = vrot.lane.b32.xlu1 %v2320_v47, %s2058_s11  ;;  %s1988_s11 = scalar_lea.vmem %s1987_s28, 256 }
 0x4b5   : > { %v785_v40 = vpop.xlane.xlu1 %784 }
 0x4b6   : > { %1912 = vrcp.f32 %v785_v40  ;;  %v1878_v40 = vld [vmem:[%s2522_s7 + $0x10] ss:$8 sps:$4 sm:$0xff]  }
 0x4b9   : > { %v901_v46 = vpop.permute.xlu1 %900 }
 0x4ba   : > { %v906_v49 = vsel %vm681_vm3, %v901_v46, 0 }
 0x4bd   : > { %v896_v41 = vpop.xlane.xlu0 %895 }
 0x4be   : > { %1914 = vrcp.f32 %v896_v41  ;;  %v1883_v41 = vld [vmem:[%s2522_s7 + $0x4] ss:$8 sps:$4 sm:$0xff]  }
 0x4c1   : > { %v791_v42 = vpop.permute.xlu0 %790 }
 0x4c2   : > { %v796_v43 = vsel %vm681_vm3, %v791_v42, 0  ;;  %v1881_v42 = vld [vmem:[%s2522_s7] ss:$8 sps:$4 sm:$0xff]  }
 0x4c3   : > { %v1913_v44 = vpop.eup %1912  ;;  %1749 = vmatpush3.bf16.msra.mxu1 %v796_v43 }
 0x4c4   : > { %1760 = vmatprep.subr.bf16.mxu1 %v2054_v9  ;;  %v787_v45 = vmul.f32 %v1913_v44, %v1905_v27 }
 0x4c6   : > { %v788_v48 = vpack.c.bf16 %v787_v45, %v787_v45 }
 0x4c8   : > { %1751 = vmatmul.mubr.msk.bf16.vlgmr.msra.gmra.mxu1 %vm665_vm4, %v788_v48 }
 0x4c9   : > { %1761 = vmatpush3.bf16.msra.mxu1 %v906_v49  ;;  %1762 = vmatprep.mubr.msk.bf16.mxu1 %vm2055_vm1, %v2054_v9 }
 0x4ca   : > { %1772 = vmatprep.subr.bf16.mxu1 %v2054_v9 }
 0x4cb   : > { %v1915_v47 = vpop.eup %1914 }
 0x4cc   : > { %v898_v50 = vmul.f32 %v1915_v47, %v1907_v29  ;;  %v1884_v47 = vld [vmem:[%s2523_s8 + $0x78] sm:$0xff]  }
 0x4cd   : > { %1672 = vmatprep.subr.bf16.mxu0 %v1884_v47 }
 0x4ce   : > { %v899_v51 = vpack.c.bf16 %v898_v50, %v898_v50  ;;  %v1885_v50 = vld [vmem:[%s2523_s8 + $0x38] sm:$0xff]  }
 0x4d0   : > { %1763 = vmatmul.mubr.msk.bf16.vlgmr.msra.gmra.mxu1 %vm665_vm4, %v899_v51  ;;  %v1886_v51 = vld [vmem:[%s2523_s8 + $0x70] sm:$0xff]  }
 0x4d1   : > { %1774 = vmatprep.mubr.msk.bf16.mxu1 %vm2055_vm1, %v2054_v9 }
 0x4ea   : > { %v1006_v52 = vpop.xlane.xlu1 %1005 }
 0x4eb   : > { %1916 = vrcp.f32 %v1006_v52  ;;  %v1887_v52 = vld [vmem:[%s2523_s8 + $0x30] sm:$0xff]  }
 0x4ee   : > { %v1011_v53 = vpop.permute.xlu1 %1010 }
 0x4ef   : > { %v1016_v54 = vsel %vm681_vm3, %v1011_v53, 0  ;;  %v1888_v53 = vld [vmem:[%s2523_s8 + $0x68] sm:$0xff]  }
 0x4f0   : > { %1773 = vmatpush3.bf16.msra.mxu1 %v1016_v54  ;;  %v1889_v54 = vld [vmem:[%s2523_s8 + $0x28] sm:$0xff]  }
 0x4f1   : > { %1242 = vmatprep.subr.bf16.mxu1 %v1874_v35 }
 0x4f8   : > { %v1917_v55 = vpop.eup %1916 }
 0x4f9   : > { %v1008_v56 = vmul.f32 %v1917_v55, %v1911_v38  ;;  %v2062_v38 = vmov 0   ;;  %v1890_v55 = vld [vmem:[%s2523_s8 + $0x60] sm:$0xff]  }
 0x4fb   : > { %v1009_v57 = vpack.c.bf16 %v1008_v56, %v1008_v56  ;;  %v1891_v56 = vld [vmem:[%s2523_s8 + $0x20] sm:$0xff]  }
 0x4fd   : > { %1775 = vmatmul.mubr.msk.bf16.vlgmr.msra.gmra.mxu1 %vm665_vm4, %v1009_v57  ;;  %v1892_v57 = vld [vmem:[%s2523_s8 + $0x58] sm:$0xff]  }
 0x4fe   : > { %1266 = vmatprep.mubr.bf16.mxu1 %v2062_v38 }
 0x515   : > { %v719_v58 = vpop.f32.mrf.mxu1 }
 0x517   : > { %v1740_v59 = vpop.f32.mrf.mxu1 }
 0x518   : > { %v1894_v59 = vld [vmem:[%s2523_s8 + $0x50] sm:$0xff]  }
 0x519   : > { %v722_v60 = vpop.f32.mrf.mxu1 }
 0x51a   : > { %v1895_v60 = vld [vmem:[%s2523_s8 + $0x10] sm:$0xff]  }
 0x51b   : > { %v1741_v61 = vpop.f32.mrf.mxu1 }
 0x51c   : > { %v1896_v61 = vld [vmem:[%s2523_s8 + $0x48] sm:$0xff]  }
 0x588   : > { %v832_v1 = vpop.f32.mrf.mxu1 }
 0x589   : > { %1059 = vrot.lane.b32.xlu0 %v832_v1, %s2059_s24  ;;  %v1899_v1 = vld [vmem:[%s2523_s8] sm:$0xff]  }
 0x58a   : > { %v1752_v2 = vpop.f32.mrf.mxu1 }
 0x58b   : > { %v1181_v2 = vlaneseq }
 0x58c   : > { %v835_v4 = vpop.f32.mrf.mxu1 }
 0x58d   : > { %v1182_v3 = vshrl.u32 %v1181_v2, 7 }
 0x58e   : > { %v1753_v5 = vpop.f32.mrf.mxu1 }
 0x58f   : > { %v1183_v4 = vsub.s32 0, %v1182_v3  ;;  %v1179_v5 = vld [vmem:[%s2517_s2] sm:$0x3] }
 0x590   : > { %v942_v6 = vpop.f32.mrf.mxu1 }
 0x591   : > { %1063 = vrot.lane.b32.xlu1 %v942_v6, %s2060_s21  ;;  %v1187_v6 = vsub.s32 1, %v1182_v3  ;;  %s1482_s21 = sshll.u32 %s360_s27, 4  ;;  %s1483_s21 = int_to_ptr.vmem [resolvable:$true] %s1482_s21 }
 0x592   : > { %v1764_v7 = vpop.f32.mrf.mxu1  ;;  %s1982_s14 = scalar_lea.vmem %s1483_s21, 128  ;;  %p1989_p1 = scmp.lt.s32.totalorder %s1483_s21, %s1987_s28 }
 0x593   : > { %v1184_v7 = vrot.slane %v1179_v5, %v1183_v4  ;;  %p1983_p9 = scmp.ne.s32.totalorder %s1483_s21, %s1982_s14  ;;  %p1990_p2 = scmp.lt.s32.totalorder %s1988_s11, %s1982_s14 }
 0x594   : > { %v945_v8 = vpop.f32.mrf.mxu1 }
 0x595   : > { %v1188_v8 = vrot.slane %v1179_v5, %v1187_v6  ;;  %p1984_p13 = pnand %p1983_p9, %p2549_p11  ;;  %p1991_p0 = por %p1990_p2, %p1989_p1 }
 0x596   : > { %v1765_v10 = vpop.f32.mrf.mxu1 }
 0x597   : > { %p1985_p10 = pneg %p1984_p13 }
 0x599   : > { %p1992_p3 = pnand %p1991_p0, %p1985_p10 }
 0x5bd   : > { %v1052_v12 = vpop.f32.mrf.mxu1 }
 0x5be   : > { %1067 = vrot.lane.b32.xlu0 %v1052_v12, %s2061_s18  ;;  %s1480_s18 = scalar_lea.hbm %s2524_s9, %s1633_s26 }
 0x5bf   : > { %v1776_v13 = vpop.f32.mrf.mxu1 }
 0x5c1   : > { %v1055_v14 = vpop.f32.mrf.mxu1 }
 0x5c3   : > { %v1777_v15 = vpop.f32.mrf.mxu1 }
 0x5fb   : > { %v1060_v16 = vpop.permute.xlu0 %1059 }
 0x5fc   : > { %v1070_v17 = vsel %vm618_vm2, %v719_v58, %v1060_v16  ;;  %v1893_v58 = vld [vmem:[%s2523_s8 + $0x18] sm:$0xff]  }
 0x603   : > { %v1064_v9 = vpop.permute.xlu1 %1063 }
 0x604   : > { %v1072_v18 = vsel %vm1071_vm5, %v1070_v17, %v1064_v9 }
 0x630   : > { %v1068_v19 = vpop.permute.xlu0 %1067 }
 0x631   : > { %v1074_v20 = vsel %vm1073_vm6, %v1072_v18, %v1068_v19 }
 0x632   : > { %v1075_v21 = vpack.c.bf16 %v1074_v20, %v1074_v20 }
 0x634   : > { %1787 = vmatmul.mubr.msk.bf16.vlgmr.msra.gmra.mxu0 %vm368_vm0, %v1075_v21 }
 0x635   : > { %1673 = vmatpush3.bf16.msra.mxu0 %v1885_v50 }
 0x636   : > { %1674 = vmatprep.subr.bf16.mxu0 %v1886_v51 }
 0x639   : > { %1675 = vmatpush3.bf16.msra.mxu0 %v1887_v52 }
 0x63a   : > { %1676 = vmatprep.subr.bf16.mxu0 %v1888_v53 }
 0x63d   : > { %1677 = vmatpush3.bf16.msra.mxu0 %v1889_v54 }
 0x63e   : > { %1678 = vmatprep.subr.bf16.mxu0 %v1890_v55 }
 0x641   : > { %1679 = vmatpush3.bf16.msra.mxu0 %v1891_v56 }
 0x642   : > { %1680 = vmatprep.subr.bf16.mxu0 %v1892_v57 }
 0x645   : > { %1681 = vmatpush3.bf16.msra.mxu0 %v1893_v58 }
 0x646   : > { %1682 = vmatprep.subr.bf16.mxu0 %v1894_v59 }
 0x649   : > { %1683 = vmatpush3.bf16.msra.mxu0 %v1895_v60 }
 0x64a   : > { %1684 = vmatprep.subr.bf16.mxu0 %v1896_v61 }
 0x64d   : > { %1685 = vmatpush3.bf16.msra.mxu0 %v1897_v62 }
 0x64e   : > { %1686 = vmatprep.subr.bf16.mxu0 %v1898_v63 }
 0x651   : > { %1687 = vmatpush3.bf16.msra.mxu0 %v1899_v1 }
 0x6f4   : > { %v1145_v23 = vpop.f32.mrf.mxu0 }
 0x6f5   : > { %v1151_v24 = vadd.f32 %v1145_v23, %v2247_v0  ;;  %v1872_v0 = vld [vmem:[%s2522_s7 + $0x30] ss:$8 sps:$4 sm:$0xff]  }
 0x6f6   : > { %v1788_v25 = vpop.f32.mrf.mxu0  ;;  %1243 = vmatpush1.bf16.msra.mxu1 %v1872_v0 }
 0x6f7   : > { %v2394_v26 = vadd.f32 %v1603_v22, %v1151_v24  ;;  %1244 = vmatprep.subr.bf16.mxu1 %v1877_v36 }
 0x6f8   : > { %v1148_v27 = vpop.f32.mrf.mxu0 }
 0x6f9   : > { %v1157_v28 = vsel %vm368_vm0, %v2394_v26, 0.0 }
 0x6fa   : > { %1158 = vadd.xlane.f32.xlu1 %v1157_v28  ;;  %v1789_v29 = vpop.f32.mrf.mxu0  ;;  %1245 = vmatpush1.bf16.msra.mxu1 %v1875_v37 }
 0x6fb   : > { %1246 = vmatprep.subr.bf16.mxu1 %v1880_v39 }
 0x6fe   : > { %1247 = vmatpush1.bf16.msra.mxu1 %v1878_v40 }
 0x6ff   : > { %1248 = vmatprep.subr.bf16.mxu1 %v1883_v41 }
 0x702   : > { %1249 = vmatpush1.bf16.msra.mxu1 %v1881_v42 }
 0x783   : > { %v1159_v30 = vpop.xlane.xlu1 %1158 }
 0x784   : > { %v1160_v31 = vmul.f32 0.015625, %v1159_v30 }
 0x786   : > { %v1161_v32 = vsub.f32 %v2394_v26, %v1160_v31 }
 0x788   : > { %v1162_v33 = vmul.f32 %v1161_v32, %v1161_v32 }
 0x78a   : > { %v1163_v34 = vsel %vm368_vm0, %v1162_v33, 0.0  ;;  %v1631_v33 = vld [vmem:[#allocation5 + $0x4] ss:$0 sm:$0xff] }
 0x78b   : > { %1164 = vadd.xlane.f32.xlu0 %v1163_v34 }
 0x814   : > { %v1165_v43 = vpop.xlane.xlu0 %1164 }
 0x815   : > { %v1166_v44 = vmul.f32 0.015625, %v1165_v43 }
 0x817   : > { %v1167_v45 = vadd.f32 1e-05, %v1166_v44 }
 0x819   : > { %1918 = vrsqrt.f32 %v1167_v45 }
 0x826   : > { %v1919_v46 = vpop.eup %1918 }
 0x827   : > { %v1169_v48 = vmul.f32 %v1919_v46, %v1161_v32 }
 0x829   : > { %v1170_v49 = vpack.c.bf16 %v1169_v48, %v1169_v48 }
 0x82b   : > { %1612 = vmatmul.mubr.msk.bf16.vlgmr.msra.gmra.mxu1 %vm368_vm0, %v1170_v49 }
 0x8eb   : > { %v1268_v10 = vpop.f32.mrf.mxu1 }
 0x8ec   : > { %v1269_v11 = vadd.f32 %v1268_v10, %v1184_v7 }
 0x8ed   : > { %v1270_v12 = vpop.f32.mrf.mxu1 }
 0x8ee   : > { %v1613_v13 = vmul.f32 -1.702, %v1269_v11  ;;  %v1271_v14 = vadd.f32 %v1270_v12, %v1188_v8 }
 0x8ef   : > { %v1272_v15 = vpop.f32.mrf.mxu1 }
 0x8f0   : > { %v1279_v16 = vmul.f32 1.442695, %v1613_v13  ;;  %v1614_v9 = vmul.f32 -1.702, %v1271_v14 }
 0x8f1   : > { %v1273_v17 = vpop.f32.mrf.mxu1 }
 0x8f2   : > { %1920 = vpow2.f32 %v1279_v16  ;;  %v1281_v18 = vmul.f32 1.442695, %v1614_v9 }
 0x8f4   : > { %1922 = vpow2.f32 %v1281_v18 }
 0x8ff   : > { %v1921_v19 = vpop.eup %1920 }
 0x900   : > { %v1283_v20 = vadd.f32 1.0, %v1921_v19 }
 0x901   : > { %v1923_v21 = vpop.eup %1922 }
 0x902   : > { %1924 = vrcp.f32 %v1283_v20  ;;  %v1284_v22 = vadd.f32 1.0, %v1923_v21 }
 0x904   : > { %1926 = vrcp.f32 %v1284_v22 }
 0x90f   : > { %v1925_v23 = vpop.eup %1924 }
 0x910   : > { %v1289_v25 = vmul.f32 %v1925_v23, %v1269_v11 }
 0x911   : > { %v1927_v24 = vpop.eup %1926 }
 0x912   : > { %v1290_v27 = vmul.f32 %v1927_v24, %v1271_v14  ;;  %v1291_v29 = vpack.c.bf16 %v1289_v25, %v1289_v25 }
 0x914   : > { %v1292_v28 = vpack.c.bf16 %v1290_v27, %v1290_v27 }
 0x916   : > { %1453 = vmatprep.mubr.bf16.mxu0 %v1292_v28 }
 0x917   : > { %1454 = vmatmul.mubr.bf16.vlgmr.msra.gmra.mxu0 %v1291_v29 }
 0x9d7   : > { %v1688_v30 = vpop.f32.mrf.mxu0 }
 0x9d9   : > { %v1689_v31 = vpop.f32.mrf.mxu0 }
 0x9da   : > { %v1690_v32 = vadd.f32 %v1689_v31, %v1688_v30 }
 0x9db   : > { %v1691_v34 = vpop.f32.mrf.mxu0 }
 0x9dc   : > { %v1461_v0 = vadd.f32 %v1690_v32, %v2394_v26 }
 0x9dd   : > { %v1692_v35 = vpop.f32.mrf.mxu0 }
 0x9de   : > { %v1466_v36 = vadd.f32 %v1631_v33, %v1461_v0 }
 0x9e0   : > { %1467 = vst.msk [vmem:[%s360_s27] sm:$0xff] %vm368_vm0, %v1466_v36 }
 0x9e1   : > { %1995 = shalt.err (!%p1992_p3)
}
 0x9e2   : > { %s1996_s20 = scalar_lea.hbm %s1480_s18, 128  ;;  %s2000_s17 = scalar_lea.hbm %s2524_s9, 256 }
 0x9e3   : > { %p1997_p12 = scmp.ne.s32.totalorder %s1480_s18, %s1996_s20  ;;  %p2001_p4 = scmp.lt.s32.totalorder %s1480_s18, %s2524_s9 }
 0x9e4   : > { %p2002_p6 = scmp.lt.s32.totalorder %s2000_s17, %s1996_s20 }
 0x9e5   : > { %p1998_p5 = pnand %p1997_p12, %p2549_p11 }
 0x9e6   : > { %p2003_p8 = por %p2002_p6, %p2001_p4 }
 0x9e7   : > { %p1999_p7 = pneg %p1998_p5 }
 0x9e9   : > { %p2004_p9 = pnand %p2003_p8, %p1999_p7 }
 0x9eb   : > { %2007 = shalt.err (!%p2004_p9)
}
 0x9ec   : > { %1796 = dma.vmem_to_hbm [thread:$0]  (%p2549_p11), %s1483_s21, 128, %s1480_s18, %s1469_s23  }
 0x9ed PF: > { %s1494_s26 = sand.u32 1, %s2038_s30   ;;  %p2550_p13 = scmp.ne.s32.totalorder %s2535_s16, 0 }
 0x9ee   : > { %p2551_p10 = scmp.ge.s32.totalorder %s2050_s12, 2  ;;  %s1495_s27 = scalar_lea.sflag [#allocation4], %s1494_s26 }
 0x9f0   : > { %p1807_p1 = pnand %p2551_p10, %p2550_p13 }
 0x9f2   : > { %p1808_p2 = pneg %p1807_p1 }
 0x9f4   : > { %2033 = dma.done.wait (%p1808_p2), %s1495_s27, 128  }
 0x9f5   : > { %2035 = vsyncadd (%p1808_p2), %s1495_s27, 4294967168  ;;  %s2552_s12 = sld [smem:[#allocation12_spill]]  ;;  %s2555_s30 = smov %s2042_s10 }
 0x9f6   : > { %s2553_s22 = sld [smem:[#allocation11_spill]] }
 0x9f7   : > { %s2554_s11 = sld [smem:[#allocation13_spill]] }
 0x9fb   : > { %p23_p0 = scmp.ge.s32.totalorder %s2552_s12, 4  }
 0x9fc   : > { %s2556_s10 = smov %s2553_s22 }
 0x9fd   :  { %25 = sbr.rel (!%p23_p0) target bundleno = 8 (0x8), region = 105 }
 0xa02   :  { %1500 = vsyncpa [#allocation3], 1 }
 0xa03   :  { %1502 = vsyncpa [#allocation3 + $0x1], 1 }
 0xa04   :  { %1503 = vsyncpa [#allocation6], 1 }
 0xa05   :  { %1504 = vsyncpa [#allocation4], 1 }
 0xa06   :  { %1506 = vsyncpa [#allocation4 + $0x1], 1 }

</bundles_post_ra>
